<compile_context>
chip_gen: v7x
topology: tpu7x:2x2x1
jax: 0.10.0
libtpu: 0.0.40
codegen_flags: <defaults>
</compile_context>

<pallas_src>
import jax
import jax.numpy as jnp
import numpy as np
from jax.experimental import pallas as pl
from jax.experimental.pallas import tpu as pltpu


def nlinear_kernel(x_ref, w_ref, b_ref, o_ref):
    # x_ref: [TB, S, TC]  (S on sublanes, channels on lanes)
    # w_ref: [P, S]       (resident)
    # b_ref: [P, 1]       (resident)
    # o_ref: [TB, P, TC]  (lane-dense output)
    w = w_ref[...]
    bias = b_ref[...]
    tb = x_ref.shape[0]
    for b in range(tb):                              # static unroll; TB is small
        x = x_ref[b]                                 # [S, TC]
        seq_last = x[-1:, :]                         # [1, TC]  last time step (sublane row)
        x_centered = x - seq_last                    # normalize (sublane broadcast)
        y = jnp.dot(w, x_centered,
                    preferred_element_type=jnp.float32)   # [P, TC]  MXU, contract S
        y = y + bias + seq_last                      # bias per row, seq_last per lane
        o_ref[b] = jnp.round(y)                      # half-to-even, matches torch.round


def _pick_channel_tile(C, target=512):
    """Largest multiple of 128 that divides C and is <= target, else the full C dim."""
    if C % 128 != 0:
        return C                                     # full-dim block (valid for any C)
    tc = min(C, (target // 128) * 128)
    while C % tc != 0:
        tc -= 128
    return tc


def _pick_batch_tile(B, target=8):
    """Largest divisor of B that is <= target."""
    tb = min(B, target)
    while B % tb != 0:
        tb -= 1
    return tb


def nlinear_forward(x, weight, bias, *, c_tile_target=512, b_tile_target=8):
    """x: [B, S, C] f32; weight: [P, S] f32; bias: [P] f32  ->  [B, P, C] f32."""
    B, S, C = x.shape
    P = weight.shape[0]

    TC = _pick_channel_tile(C, c_tile_target)
    TB = _pick_batch_tile(B, b_tile_target)
    grid = (B // TB, C // TC)

    b2d = bias.reshape(P, 1)                         # broadcastable over the lane (C) axis

    # Conservative, explicit VMEM budget: double-buffered x/out tiles + resident w/b,
    # with generous headroom; stays well under v5e's 16 MiB scope and v7x's 64 MiB VMEM.
    tile_bytes = 2 * (TB * S * TC + TB * P * TC) * 4 + (P * S + P) * 4
    vmem_limit = int(min(max(4 * tile_bytes, 4 * 1024 * 1024), 32 * 1024 * 1024))

    out = pl.pallas_call(
        nlinear_kernel,
        out_shape=jax.ShapeDtypeStruct((B, P, C), jnp.float32),
        grid=grid,
        in_specs=[
            pl.BlockSpec((TB, S, TC), lambda b, c: (b, 0, c)),   # x tile
            pl.BlockSpec((P, S), lambda b, c: (0, 0)),           # weight, resident
            pl.BlockSpec((P, 1), lambda b, c: (0, 0)),            # bias, resident
        ],
        out_specs=pl.BlockSpec((TB, P, TC), lambda b, c: (b, 0, c)),
        compiler_params=pltpu.CompilerParams(
            dimension_semantics=("parallel", "parallel"),
            vmem_limit_bytes=vmem_limit,
        ),
    )(x, weight, b2d)
    return out


def nlinear_reference(x, weight, bias):
    seq_last = x[:, -1:, :]
    xc = x - seq_last
    y = jnp.einsum('bsc,ps->bpc', xc, weight) + bias[None, :, None]
    return jnp.round(y + seq_last)


def _run_case(key, B, S, P, C):
    k_x, k_w, k_b = jax.random.split(key, 3)
    bound = 1.0 / np.sqrt(S)                         # nn.Linear default init range
    weight = jax.random.uniform(k_w, (P, S), jnp.float32, -bound, bound)
    bias = jax.random.uniform(k_b, (P,), jnp.float32, -bound, bound)
    x = jax.random.normal(k_x, (B, S, C), jnp.float32) * 3.0

    out = jax.block_until_ready(nlinear_forward(x, weight, bias))
    ref = nlinear_reference(x, weight, bias)
    assert out.shape == (B, P, C), out.shape
    np.testing.assert_allclose(np.asarray(out), np.asarray(ref), atol=1e-5)


if __name__ == "__main__":
    key = jax.random.PRNGKey(0)
    k1, k2 = jax.random.split(key)

    # config matching the module spec: seq_len=8, pred_len=4, channels=4, batch=2
    _run_case(k1, B=2, S=8, P=4, C=4)
    # lane-dense / tiled path: channels = 256 exercises the 128-multiple channel tiling
    _run_case(k2, B=2, S=8, P=4, C=256)

    print("KERNEL_OK")
</pallas_src>

<mosaic_0001>
module attributes {stable_mosaic.version = 11 : i64} {
  func.func @nlinear_kernel(%arg0: i32, %arg1: i32, %arg2: memref<2x8x4xf32, #tpu.memory_space<vmem>>, %arg3: memref<4x8xf32, #tpu.memory_space<vmem>>, %arg4: memref<4x1xf32, #tpu.memory_space<vmem>>, %arg5: memref<2x4x4xf32, #tpu.memory_space<vmem>>) attributes {dimension_semantics = [#tpu.dimension_semantics<parallel>, #tpu.dimension_semantics<parallel>], iteration_bounds = array<i64: 1, 1>, scalar_prefetch = 0 : i64, scratch_operands = 0 : i64, tpu.core_type = #tpu.core_type<tc>, window_params = [{transform_indices = @transform_0, window_bounds = array<i64: 2, 8, 4>}, {pipeline_mode = #tpu.pipeline_mode<synchronous>, transform_indices = @transform_1, window_bounds = array<i64: 4, 8>}, {pipeline_mode = #tpu.pipeline_mode<synchronous>, transform_indices = @transform_2, window_bounds = array<i64: 4, 1>}, {transform_indices = @transform_3, window_bounds = array<i64: 2, 4, 4>}]} {
    %c0 = arith.constant 0 : index
    %c0_0 = arith.constant 0 : index
    %0 = vector.load %arg3[%c0, %c0_0] : memref<4x8xf32, #tpu.memory_space<vmem>>, vector<4x8xf32>
    %c0_1 = arith.constant 0 : index
    %c0_2 = arith.constant 0 : index
    %1 = vector.load %arg4[%c0_1, %c0_2] : memref<4x1xf32, #tpu.memory_space<vmem>>, vector<4x1xf32>
    %c0_3 = arith.constant 0 : index
    %c0_4 = arith.constant 0 : index
    %c0_5 = arith.constant 0 : index
    %2 = vector.load %arg2[%c0_3, %c0_4, %c0_5] : memref<2x8x4xf32, #tpu.memory_space<vmem>>, vector<1x8x4xf32>
    %3 = vector.shape_cast %2 : vector<1x8x4xf32> to vector<8x4xf32>
    %4 = vector.extract_strided_slice %3 {offsets = [7, 0], sizes = [1, 4], strides = [1, 1]} : vector<8x4xf32> to vector<1x4xf32>
    %5 = vector.broadcast %4 : vector<1x4xf32> to vector<8x4xf32>
    %6 = arith.subf %3, %5 : vector<8x4xf32>
    %cst = arith.constant dense<0.000000e+00> : vector<4x4xf32>
    %7 = tpu.matmul %0, %6, %cst {dimension_numbers = #tpu.dot_dimension_numbers<[1], [0], [0], [1], [0, 0, 1, 1], [], []>} : vector<4x8xf32>, vector<8x4xf32>, vector<4x4xf32> -> vector<4x4xf32>
    %8 = vector.broadcast %1 : vector<4x1xf32> to vector<4x4xf32>
    %9 = arith.addf %7, %8 : vector<4x4xf32>
    %10 = vector.broadcast %4 : vector<1x4xf32> to vector<4x4xf32>
    %11 = arith.addf %9, %10 : vector<4x4xf32>
    %12 = math.roundeven %11 : vector<4x4xf32>
    %c0_6 = arith.constant 0 : index
    %c0_7 = arith.constant 0 : index
    %c0_8 = arith.constant 0 : index
    %13 = vector.load %arg5[%c0_6, %c0_7, %c0_8] : memref<2x4x4xf32, #tpu.memory_space<vmem>>, vector<1x4x4xf32>
    %14 = vector.shape_cast %13 : vector<1x4x4xf32> to vector<4x4xf32>
    %15 = vector.shape_cast %12 : vector<4x4xf32> to vector<1x4x4xf32>
    tpu.vector_store %arg5[%c0_6, %c0_7, %c0_8], %15 {strides = array<i32>} : memref<2x4x4xf32, #tpu.memory_space<vmem>>, vector<1x4x4xf32>,
    %c1 = arith.constant 1 : index
    %c0_9 = arith.constant 0 : index
    %c0_10 = arith.constant 0 : index
    %16 = vector.load %arg2[%c1, %c0_9, %c0_10] : memref<2x8x4xf32, #tpu.memory_space<vmem>>, vector<1x8x4xf32>
    %17 = vector.shape_cast %16 : vector<1x8x4xf32> to vector<8x4xf32>
    %18 = vector.extract_strided_slice %17 {offsets = [7, 0], sizes = [1, 4], strides = [1, 1]} : vector<8x4xf32> to vector<1x4xf32>
    %19 = vector.broadcast %18 : vector<1x4xf32> to vector<8x4xf32>
    %20 = arith.subf %17, %19 : vector<8x4xf32>
    %cst_11 = arith.constant dense<0.000000e+00> : vector<4x4xf32>
    %21 = tpu.matmul %0, %20, %cst_11 {dimension_numbers = #tpu.dot_dimension_numbers<[1], [0], [0], [1], [0, 0, 1, 1], [], []>} : vector<4x8xf32>, vector<8x4xf32>, vector<4x4xf32> -> vector<4x4xf32>
    %22 = vector.broadcast %1 : vector<4x1xf32> to vector<4x4xf32>
    %23 = arith.addf %21, %22 : vector<4x4xf32>
    %24 = vector.broadcast %18 : vector<1x4xf32> to vector<4x4xf32>
    %25 = arith.addf %23, %24 : vector<4x4xf32>
    %26 = math.roundeven %25 : vector<4x4xf32>
    %c1_12 = arith.constant 1 : index
    %c0_13 = arith.constant 0 : index
    %c0_14 = arith.constant 0 : index
    %27 = vector.load %arg5[%c1_12, %c0_13, %c0_14] : memref<2x4x4xf32, #tpu.memory_space<vmem>>, vector<1x4x4xf32>
    %28 = vector.shape_cast %27 : vector<1x4x4xf32> to vector<4x4xf32>
    %29 = vector.shape_cast %26 : vector<4x4xf32> to vector<1x4x4xf32>
    tpu.vector_store %arg5[%c1_12, %c0_13, %c0_14], %29 {strides = array<i32>} : memref<2x4x4xf32, #tpu.memory_space<vmem>>, vector<1x4x4xf32>,
    return
  }
  func.func @transform_0(%arg0: i32, %arg1: i32) -> (i32, i32, i32) {
    %c0_i32 = arith.constant 0 : i32
    %c0_i32_0 = arith.constant 0 : i32
    return %arg0, %c0_i32, %arg1 : i32, i32, i32
  }
  func.func @transform_1(%arg0: i32, %arg1: i32) -> (i32, i32) {
    %c0_i32 = arith.constant 0 : i32
    %c0_i32_0 = arith.constant 0 : i32
    %c0_i32_1 = arith.constant 0 : i32
    return %c0_i32, %c0_i32_0 : i32, i32
  }
  func.func @transform_2(%arg0: i32, %arg1: i32) -> (i32, i32) {
    %c0_i32 = arith.constant 0 : i32
    %c0_i32_0 = arith.constant 0 : i32
    %c0_i32_1 = arith.constant 0 : i32
    return %c0_i32, %c0_i32_0 : i32, i32
  }
  func.func @transform_3(%arg0: i32, %arg1: i32) -> (i32, i32, i32) {
    %c0_i32 = arith.constant 0 : i32
    %c0_i32_0 = arith.constant 0 : i32
    return %arg0, %c0_i32, %arg1 : i32, i32, i32
  }
}

</mosaic_0001>

<bundles_post_ra>
// kernel: tpu_custom_call.1
= control target key start
LH: loop header
LB: loop body
LE: loop exit
PB: predicated region body
PF: predicated region fallthrough
CT: control target
= control target key end

     0   :  { %v18_v0 = vlaneseq  ;;  %v253_v1 = vmov 0.0   ;;  %s303_s0 = inlined_call_operand.vmem [shape: f32[2,8,4], index: 0, kind: input, shape index: {}]   ;;  %s304_s1 = inlined_call_operand.vmem [shape: f32[4,8], index: 1, kind: input, shape index: {}]   ;;  %s305_s2 = inlined_call_operand.vmem [shape: f32[4,1], index: 2, kind: input, shape index: {}]   ;;  %s306_s3 = inlined_call_operand.hbm [shape: f32[2,4,4], index: 3, kind: output, shape index: {}]  }
   0x1   :  { %210 = vmatprep.subr.mxu0 %v253_v1  ;;  %215 = vmatprep.subr.mxu1 %v253_v1  ;;  %v16_v2 = vld [vmem:[%s305_s2] sm:$0xf] }
   0x2   :  { %8 = vsyncpa [#allocation3], 0  ;;  %v19_v3 = vshrl.u32 %v18_v0, 7  ;;  %vm254_vm0 = vmmov 0   ;;  %v17_v4 = vld [vmem:[%s303_s0] sm:$0xff]  ;;  %v204_v5 = vld [vmem:[%s303_s0 + $0x8] sm:$0xff] }
   0x3   :  { %212 = vmatprep.mubr.msk.f32.mxu0 %vm254_vm0, %v253_v1  ;;  %217 = vmatprep.mubr.msk.f32.mxu1 %vm254_vm0, %v253_v1  ;;  %v255_v6 = vmov 0   ;;  %v15_v12 = vld [vmem:[%s304_s1] sm:$0xf]  ;;  %vm28_vm1 = vcmask 64512   ;;  %s256_s0 = smov [#allocation2]   ;;  %vm104_vm2 = vcmask 27648  }
   0x4   :  { %228 = vset.pattern.permute.xlu0 %v255_v6  ;;  %v20_v7 = vsub.s32 7, %v19_v3  ;;  %s192_s19 = sshll.u32 %s256_s0, 4  ;;  %s193_s19 = int_to_ptr.vmem [resolvable:$true] %s192_s19 }
   0x5   :  { %25 = vperm.xlu0 %228, %v16_v2   ;;  %s229_s1 = scalar_lea.vmem %s193_s19, 128  ;;  %p234_p1 = scmp.lt.s32.totalorder %s193_s19, %s193_s19 }
   0x6   :  { %v21_v8 = vrot.slane %v17_v4, %v20_v7  ;;  %v111_v9 = vrot.slane %v204_v5, %v20_v7  ;;  %p230_p0 = scmp.ne.s32.totalorder %s193_s19, %s229_s1  ;;  %p235_p2 = scmp.lt.s32.totalorder %s229_s1, %s229_s1 }
   0x8   :  { %v22_v10 = vsub.f32 %v17_v4, %v21_v8  ;;  %v112_v11 = vsub.f32 %v204_v5, %v111_v9  ;;  %p236_p3 = por %p235_p2, %p234_p1 }
   0xa   :  { %211 = vmatpush3.msra.mxu0 %v22_v10  ;;  %216 = vmatpush3.msra.mxu1 %v112_v11  ;;  %p237_p4 = pnand %p236_p3, %p230_p0 }
   0xb   :  { %213 = vmatmul.mubr.msk.f32.vlgmr.msra.gmra.mrb[0].mxu0 %vm28_vm1, %v15_v12  ;;  %218 = vmatmul.mubr.msk.f32.vlgmr.msra.gmra.mrb[0].mxu1 %vm28_vm1, %v15_v12 }
  0x84   :  { %v26_v13 = vpop.permute.xlu0 %25 }
  0xde   :  { %v98_v14 = vpop.f32.mrb[0].mxu0  ;;  %v179_v15 = vpop.f32.mrb[0].mxu1 }
  0xdf   :  { %v99_v16 = vadd.f32 %v98_v14, %v26_v13  ;;  %v180_v17 = vadd.f32 %v179_v15, %v26_v13  ;;  %v214_v18 = vpop.f32.mrb[1].mxu0  ;;  %v219_v19 = vpop.f32.mrb[1].mxu1 }
  0xe1   :  { %v102_v20 = vadd.f32 %v99_v16, %v21_v8  ;;  %v183_v21 = vadd.f32 %v180_v17, %v111_v9 }
  0xe3   :  { %v220_v22 = vround.rtne.f32 %v102_v20  ;;  %v221_v23 = vround.rtne.f32 %v183_v21 }
  0xe5   :  { %105 = vst.msk [vmem:[#allocation2] sm:$0xf] %vm104_vm2, %v220_v22  ;;  %186 = vst.msk [vmem:[#allocation2 + $0x4] sm:$0xf] %vm104_vm2, %v221_v23 }
  0xe6   :  { %240 = shalt.err (!%p237_p4)
}
  0xe7   :  { %s241_s22 = scalar_lea.hbm %s306_s3, 128 }
  0xe8   :  { %p242_p5 = scmp.ne.s32.totalorder %s306_s3, %s241_s22  ;;  %p245_p6 = scmp.lt.u32.totalorder %s241_s22, %s306_s3 }
  0xea   :  { %p247_p7 = pnand %p245_p6, %p242_p5 }
  0xec   :  { %250 = shalt.err (!%p247_p7)
}
  0xed   :  { %s257_s27 = smov 64   ;;  %s258_s28 = smov 4  }
  0xee   :  { %198 = dma.vmem_to_hbm [thread:$0]  %s193_s19, 128, %s306_s3, [#allocation3], %s257_s27, %s257_s27, %s258_s28  }
  0xef   :  { %251 = dma.done.wait [#allocation3], 128  }
  0xf0   :  { %252 = vsyncadd [#allocation3], 4294967168 }
  0xf1   :  { %202 = vsyncpa [#allocation3], 1 }

</bundles_post_ra>
